<compile_context>
chip_gen: v6e
topology: v6e:2x2x1
jax: 0.10.0
libtpu: 0.0.40
codegen_flags: <defaults>
</compile_context>

<pallas_src>
import functools

import jax
import jax.numpy as jnp
from jax import lax
from jax.experimental import pallas as pl
from jax.experimental.pallas import tpu as pltpu


def _prob_nn_kernel(xT_ref,
                    w1_ref, b1_ref,
                    w2_ref, b2_ref,
                    w3_ref, b3_ref,
                    wmT_ref, bm_ref,
                    wvT_ref, bv_ref,
                    mean_ref, logvar_ref):
    """One batch tile.  xT_ref: [in_dim, TILE_B].  mean/logvar refs: [D, TILE_B]."""
    xT = xT_ref[...]
    w1 = w1_ref[...]                                      # [64, in_dim] f32

    # fc1 + relu.  For in_dim == 1 the contraction is trivial -> VPU outer product.
    if w1.shape[1] == 1:
        h1 = w1 * xT                                      # [64,1] * [1,T] -> [64,T]
    else:
        h1 = jnp.dot(w1, xT, preferred_element_type=jnp.float32)
    h1 = jnp.maximum(h1 + b1_ref[...], 0.0)               # f32 [64, T]

    # fc2 + relu (bf16 operands, f32 accumulate).          [32,64] @ [64,T]
    h2 = jnp.dot(w2_ref[...], h1.astype(jnp.bfloat16),
                 preferred_element_type=jnp.float32) + b2_ref[...]
    h2 = jnp.maximum(h2, 0.0)                              # f32 [32, T]

    # fused fc3_mean || fc3_logvar + relu (bf16 operands).  [32,32] @ [32,T]
    h3 = jnp.dot(w3_ref[...], h2.astype(jnp.bfloat16),
                 preferred_element_type=jnp.float32) + b3_ref[...]
    h3 = jnp.maximum(h3, 0.0)                              # f32 [32, T]
    h3m = h3[:16]                                          # rows 0:16  -> mean branch
    h3v = h3[16:]                                          # rows 16:32 -> logvar branch

    # Output heads (16 -> D).  For D == 1 use VPU broadcast-mul + sublane reduce so
    # the tiny-M matmul never touches the MXU result path.
    D = bm_ref.shape[0]
    if D == 1:
        mean_t = jnp.sum(wmT_ref[...] * h3m, axis=0, keepdims=True) + bm_ref[...]
        logvar_t = jnp.sum(wvT_ref[...] * h3v, axis=0, keepdims=True) + bv_ref[...]
    else:
        dn = (((0,), (0,)), ((), ()))                      # contract the 16-dim
        mean_t = lax.dot_general(wmT_ref[...], h3m, dn,
                                 preferred_element_type=jnp.float32) + bm_ref[...]
        logvar_t = lax.dot_general(wvT_ref[...], h3v, dn,
                                   preferred_element_type=jnp.float32) + bv_ref[...]

    mean_ref[...] = mean_t.astype(mean_ref.dtype)
    logvar_ref[...] = logvar_t.astype(logvar_ref.dtype)


def init_params(key, input_dim=1, output_val_dim=1, dtype=jnp.float32):
    """Synthetic params with torch.nn.Linear layout: W [out, in], b [out]."""
    sizes = [
        ("fc1", input_dim, 64),
        ("fc2", 64, 32),
        ("fc3_mean", 32, 16),
        ("fc3_logvar", 32, 16),
        ("mean", 16, output_val_dim),
        ("logvar", 16, output_val_dim),
    ]
    params = {}
    for name, fan_in, fan_out in sizes:
        key, kw, kb = jax.random.split(key, 3)
        bound = 1.0 / (fan_in ** 0.5)   # mimic torch default U(-1/sqrt(fan_in), ...)
        params[name + "_w"] = jax.random.uniform(
            kw, (fan_out, fan_in), dtype, minval=-bound, maxval=bound)
        params[name + "_b"] = jax.random.uniform(
            kb, (fan_out,), dtype, minval=-bound, maxval=bound)
    return params


@functools.partial(jax.jit, static_argnames=("tile_b",))
def simple_prob_nn_forward(x, params, tile_b=16384):
    """x: [batch, input_dim] f32 -> (mean [batch, D], logvar [batch, D])."""
    batch, input_dim = x.shape
    out_dim = params["mean_w"].shape[0]

    # ---- Batch tile sizing ---------------------------------------------------
    # Force a multiple of 128 (lane width) no matter what the caller passed; never
    # larger than the 128-rounded batch; and, when the batch is big enough, give
    # the grid >= 2 steps so the v7x megacore can shard tiles across both TCs.
    tile_b = max(128, (int(tile_b) // 128) * 128)
    rounded = pl.cdiv(batch, 128) * 128
    tb = min(tile_b, rounded)
    if rounded > 128 and rounded // tb < 2:
        tb = max(128, pl.cdiv(rounded // 2, 128) * 128)
    assert tb % 128 == 0
    padded_batch = pl.cdiv(batch, tb) * tb
    grid = (padded_batch // tb,)

    # ---- Metadata-only prologue ----------------------------------------------
    # Transposed activation layout: batch on the lane (last) axis.  For in_dim == 1
    # the transpose is a pure reshape; padding is applied only if actually needed.
    if input_dim == 1:
        xT = x.reshape(1, batch)
    else:
        xT = x.T                                      # TODO(synk): copies for in_dim > 1
    if padded_batch != batch:
        xT = jnp.pad(xT, ((0, 0), (0, padded_batch - batch)))

    # Fuse the two 32->16 heads into one [32, 32] weight; bf16 matmul operands.
    w2 = params["fc2_w"].astype(jnp.bfloat16)
    w3 = jnp.concatenate([params["fc3_mean_w"], params["fc3_logvar_w"]],
                         axis=0).astype(jnp.bfloat16)                    # [32, 32]
    b3 = jnp.concatenate([params["fc3_mean_b"], params["fc3_logvar_b"]], axis=0)

    # Output head weights, transposed to [16, D] (f32; they run on the VPU for D=1).
    wmT = params["mean_w"].T
    wvT = params["logvar_w"].T

    col = lambda b: b[:, None]                         # bias -> [out, 1]
    args = (xT,
            params["fc1_w"], col(params["fc1_b"]),
            w2, col(params["fc2_b"]),
            w3, col(b3),
            wmT, col(params["mean_b"]),
            wvT, col(params["logvar_b"]))

    const = lambda a: pl.BlockSpec(a.shape, lambda i: (0, 0))   # VMEM-resident params
    in_specs = ([pl.BlockSpec((input_dim, tb), lambda i: (0, i))]
                + [const(a) for a in args[1:]])
    out_specs = (pl.BlockSpec((out_dim, tb), lambda i: (0, i)),
                 pl.BlockSpec((out_dim, tb), lambda i: (0, i)))

    meanT, logvarT = pl.pallas_call(
        _prob_nn_kernel,
        out_shape=(jax.ShapeDtypeStruct((out_dim, padded_batch), jnp.float32),
                   jax.ShapeDtypeStruct((out_dim, padded_batch), jnp.float32)),
        grid=grid,
        in_specs=in_specs,
        out_specs=out_specs,
        compiler_params=pltpu.CompilerParams(
            dimension_semantics=("parallel",),        # shard batch tiles across TCs
            vmem_limit_bytes=64 * 1024 * 1024),       # large tiles on v5e/v6e, fits v7x
    )(*args)

    # ---- Metadata-only epilogue (for out_dim == 1) -----------------------------
    if out_dim == 1:
        mean = meanT.reshape(padded_batch, 1)
        logvar = logvarT.reshape(padded_batch, 1)
        if padded_batch != batch:
            mean = mean[:batch]
            logvar = logvar[:batch]
    else:
        # TODO(synk): for out_dim > 1 the [D, batch] -> [batch, D] transpose stays in XLA.
        mean = meanT[:, :batch].T
        logvar = logvarT[:, :batch].T
    return mean, logvar


def _reference_forward_f32(x, p):
    """Pure-JAX f32 reference mirroring the PyTorch forward (W in [out, in] layout)."""
    h = jnp.maximum(x @ p["fc1_w"].T + p["fc1_b"], 0.0)
    h = jnp.maximum(h @ p["fc2_w"].T + p["fc2_b"], 0.0)
    hm = jnp.maximum(h @ p["fc3_mean_w"].T + p["fc3_mean_b"], 0.0)
    hv = jnp.maximum(h @ p["fc3_logvar_w"].T + p["fc3_logvar_b"], 0.0)
    return hm @ p["mean_w"].T + p["mean_b"], hv @ p["logvar_w"].T + p["logvar_b"]


def _reference_forward_matched(x, p):
    """Reference with the same bf16-operand / f32-accumulate numerics as the kernel."""
    bf = jnp.bfloat16
    h1 = jnp.maximum(x @ p["fc1_w"].T + p["fc1_b"], 0.0)                       # f32 fc1
    h2 = jnp.dot(h1.astype(bf), p["fc2_w"].astype(bf).T,
                 preferred_element_type=jnp.float32) + p["fc2_b"]
    h2 = jnp.maximum(h2, 0.0)
    h2b = h2.astype(bf)
    hm = jnp.maximum(jnp.dot(h2b, p["fc3_mean_w"].astype(bf).T,
                             preferred_element_type=jnp.float32)
                     + p["fc3_mean_b"], 0.0)
    hv = jnp.maximum(jnp.dot(h2b, p["fc3_logvar_w"].astype(bf).T,
                             preferred_element_type=jnp.float32)
                     + p["fc3_logvar_b"], 0.0)
    mean = hm @ p["mean_w"].T + p["mean_b"]                                    # f32 heads
    logvar = hv @ p["logvar_w"].T + p["logvar_b"]
    return mean, logvar


if __name__ == "__main__":
    key = jax.random.PRNGKey(0)
    k_params, k_x1, k_x2 = jax.random.split(key, 3)

    input_dim, output_val_dim = 1, 1
    params = init_params(k_params, input_dim=input_dim, output_val_dim=output_val_dim)

    # Small, single-tile case (default large tile_b gets clamped to 128).
    batch = 8
    x = jax.random.normal(k_x1, (batch, input_dim), jnp.float32)
    mean, logvar = simple_prob_nn_forward(x, params)
    jax.block_until_ready((mean, logvar))
    assert mean.shape == (batch, output_val_dim)
    assert logvar.shape == (batch, output_val_dim)

    m_ref, v_ref = _reference_forward_matched(x, params)
    assert jnp.allclose(mean, m_ref, atol=5e-3, rtol=5e-3)
    assert jnp.allclose(logvar, v_ref, atol=5e-3, rtol=5e-3)
    # Sanity bound vs the pure-f32 PyTorch-style reference (bf16 operand drift allowed).
    m32, v32 = _reference_forward_f32(x, params)
    assert jnp.allclose(mean, m32, atol=0.25, rtol=0.25)
    assert jnp.allclose(logvar, v32, atol=0.25, rtol=0.25)

    # Multi-tile case: exercises the batch grid, VMEM-resident weights, and padding.
    batch2 = 300
    x2 = jax.random.normal(k_x2, (batch2, input_dim), jnp.float32)
    mean2, logvar2 = simple_prob_nn_forward(x2, params, tile_b=128)
    jax.block_until_ready((mean2, logvar2))
    assert mean2.shape == (batch2, output_val_dim)
    m_ref2, v_ref2 = _reference_forward_matched(x2, params)
    assert jnp.allclose(mean2, m_ref2, atol=5e-3, rtol=5e-3)
    assert jnp.allclose(logvar2, v_ref2, atol=5e-3, rtol=5e-3)
    m322, v322 = _reference_forward_f32(x2, params)
    assert jnp.allclose(mean2, m322, atol=0.25, rtol=0.25)
    assert jnp.allclose(logvar2, v322, atol=0.25, rtol=0.25)

    print("KERNEL_OK")
</pallas_src>

<mosaic_0001>
module attributes {stable_mosaic.version = 11 : i64} {
  func.func @_prob_nn_kernel(%arg0: i32, %arg1: memref<1x128xf32, #tpu.memory_space<vmem>>, %arg2: memref<64x1xf32, #tpu.memory_space<vmem>>, %arg3: memref<64x1xf32, #tpu.memory_space<vmem>>, %arg4: memref<32x64xbf16, #tpu.memory_space<vmem>>, %arg5: memref<32x1xf32, #tpu.memory_space<vmem>>, %arg6: memref<32x32xbf16, #tpu.memory_space<vmem>>, %arg7: memref<32x1xf32, #tpu.memory_space<vmem>>, %arg8: memref<16x1xf32, #tpu.memory_space<vmem>>, %arg9: memref<1x1xf32, #tpu.memory_space<vmem>>, %arg10: memref<16x1xf32, #tpu.memory_space<vmem>>, %arg11: memref<1x1xf32, #tpu.memory_space<vmem>>, %arg12: memref<1x128xf32, #tpu.memory_space<vmem>>, %arg13: memref<1x128xf32, #tpu.memory_space<vmem>>) attributes {dimension_semantics = [#tpu.dimension_semantics<parallel>], iteration_bounds = array<i64: 1>, scalar_prefetch = 0 : i64, scratch_operands = 0 : i64, tpu.core_type = #tpu.core_type<tc>, window_params = [{transform_indices = @transform_0, window_bounds = array<i64: 1, 128>}, {pipeline_mode = #tpu.pipeline_mode<synchronous>, transform_indices = @transform_1, window_bounds = array<i64: 64, 1>}, {pipeline_mode = #tpu.pipeline_mode<synchronous>, transform_indices = @transform_2, window_bounds = array<i64: 64, 1>}, {pipeline_mode = #tpu.pipeline_mode<synchronous>, transform_indices = @transform_3, window_bounds = array<i64: 32, 64>}, {pipeline_mode = #tpu.pipeline_mode<synchronous>, transform_indices = @transform_4, window_bounds = array<i64: 32, 1>}, {pipeline_mode = #tpu.pipeline_mode<synchronous>, transform_indices = @transform_5, window_bounds = array<i64: 32, 32>}, {pipeline_mode = #tpu.pipeline_mode<synchronous>, transform_indices = @transform_6, window_bounds = array<i64: 32, 1>}, {pipeline_mode = #tpu.pipeline_mode<synchronous>, transform_indices = @transform_7, window_bounds = array<i64: 16, 1>}, {pipeline_mode = #tpu.pipeline_mode<synchronous>, transform_indices = @transform_8, window_bounds = array<i64: 1, 1>}, {pipeline_mode = #tpu.pipeline_mode<synchronous>, transform_indices = @transform_9, window_bounds = array<i64: 16, 1>}, {pipeline_mode = #tpu.pipeline_mode<synchronous>, transform_indices = @transform_10, window_bounds = array<i64: 1, 1>}, {transform_indices = @transform_11, window_bounds = array<i64: 1, 128>}, {transform_indices = @transform_12, window_bounds = array<i64: 1, 128>}]} {
    %c0 = arith.constant 0 : index
    %c0_0 = arith.constant 0 : index
    %0 = vector.load %arg1[%c0, %c0_0] : memref<1x128xf32, #tpu.memory_space<vmem>>, vector<1x128xf32>
    %c0_1 = arith.constant 0 : index
    %c0_2 = arith.constant 0 : index
    %1 = vector.load %arg2[%c0_1, %c0_2] : memref<64x1xf32, #tpu.memory_space<vmem>>, vector<64x1xf32>
    %2 = vector.broadcast %1 : vector<64x1xf32> to vector<64x128xf32>
    %3 = vector.broadcast %0 : vector<1x128xf32> to vector<64x128xf32>
    %4 = arith.mulf %2, %3 : vector<64x128xf32>
    %c0_3 = arith.constant 0 : index
    %c0_4 = arith.constant 0 : index
    %5 = vector.load %arg3[%c0_3, %c0_4] : memref<64x1xf32, #tpu.memory_space<vmem>>, vector<64x1xf32>
    %6 = vector.broadcast %5 : vector<64x1xf32> to vector<64x128xf32>
    %7 = arith.addf %4, %6 : vector<64x128xf32>
    %cst = arith.constant 0.000000e+00 : f32
    %8 = vector.broadcast %cst : f32 to vector<64x128xf32>
    %9 = arith.maximumf %7, %8 : vector<64x128xf32>
    %c0_5 = arith.constant 0 : index
    %c0_6 = arith.constant 0 : index
    %10 = vector.load %arg4[%c0_5, %c0_6] : memref<32x64xbf16, #tpu.memory_space<vmem>>, vector<32x64xbf16>
    %11 = arith.truncf %9 : vector<64x128xf32> to vector<64x128xbf16>
    %cst_7 = arith.constant dense<0.000000e+00> : vector<32x128xf32>
    %12 = tpu.matmul %10, %11, %cst_7 {dimension_numbers = #tpu.dot_dimension_numbers<[1], [0], [0], [1], [0, 0, 1, 1], [], []>} : vector<32x64xbf16>, vector<64x128xbf16>, vector<32x128xf32> -> vector<32x128xf32>
    %c0_8 = arith.constant 0 : index
    %c0_9 = arith.constant 0 : index
    %13 = vector.load %arg5[%c0_8, %c0_9] : memref<32x1xf32, #tpu.memory_space<vmem>>, vector<32x1xf32>
    %14 = vector.broadcast %13 : vector<32x1xf32> to vector<32x128xf32>
    %15 = arith.addf %12, %14 : vector<32x128xf32>
    %cst_10 = arith.constant 0.000000e+00 : f32
    %16 = vector.broadcast %cst_10 : f32 to vector<32x128xf32>
    %17 = arith.maximumf %15, %16 : vector<32x128xf32>
    %c0_11 = arith.constant 0 : index
    %c0_12 = arith.constant 0 : index
    %18 = vector.load %arg6[%c0_11, %c0_12] : memref<32x32xbf16, #tpu.memory_space<vmem>>, vector<32x32xbf16>
    %19 = arith.truncf %17 : vector<32x128xf32> to vector<32x128xbf16>
    %cst_13 = arith.constant dense<0.000000e+00> : vector<32x128xf32>
    %20 = tpu.matmul %18, %19, %cst_13 {dimension_numbers = #tpu.dot_dimension_numbers<[1], [0], [0], [1], [0, 0, 1, 1], [], []>} : vector<32x32xbf16>, vector<32x128xbf16>, vector<32x128xf32> -> vector<32x128xf32>
    %c0_14 = arith.constant 0 : index
    %c0_15 = arith.constant 0 : index
    %21 = vector.load %arg7[%c0_14, %c0_15] : memref<32x1xf32, #tpu.memory_space<vmem>>, vector<32x1xf32>
    %22 = vector.broadcast %21 : vector<32x1xf32> to vector<32x128xf32>
    %23 = arith.addf %20, %22 : vector<32x128xf32>
    %cst_16 = arith.constant 0.000000e+00 : f32
    %24 = vector.broadcast %cst_16 : f32 to vector<32x128xf32>
    %25 = arith.maximumf %23, %24 : vector<32x128xf32>
    %26 = vector.extract_strided_slice %25 {offsets = [0, 0], sizes = [16, 128], strides = [1, 1]} : vector<32x128xf32> to vector<16x128xf32>
    %27 = vector.extract_strided_slice %25 {offsets = [16, 0], sizes = [16, 128], strides = [1, 1]} : vector<32x128xf32> to vector<16x128xf32>
    %c0_17 = arith.constant 0 : index
    %c0_18 = arith.constant 0 : index
    %28 = vector.load %arg8[%c0_17, %c0_18] : memref<16x1xf32, #tpu.memory_space<vmem>>, vector<16x1xf32>
    %29 = vector.broadcast %28 : vector<16x1xf32> to vector<16x128xf32>
    %30 = arith.mulf %29, %26 : vector<16x128xf32>
    %cst_19 = arith.constant dense<0.000000e+00> : vector<128xf32>
    %31 = vector.multi_reduction <add>, %30, %cst_19 [0] : vector<16x128xf32> to vector<128xf32>
    %32 = vector.shape_cast %31 : vector<128xf32> to vector<1x128xf32>
    %c0_20 = arith.constant 0 : index
    %c0_21 = arith.constant 0 : index
    %33 = vector.load %arg9[%c0_20, %c0_21] : memref<1x1xf32, #tpu.memory_space<vmem>>, vector<1x1xf32>
    %34 = vector.broadcast %33 : vector<1x1xf32> to vector<1x128xf32>
    %35 = arith.addf %32, %34 : vector<1x128xf32>
    %c0_22 = arith.constant 0 : index
    %c0_23 = arith.constant 0 : index
    %36 = vector.load %arg10[%c0_22, %c0_23] : memref<16x1xf32, #tpu.memory_space<vmem>>, vector<16x1xf32>
    %37 = vector.broadcast %36 : vector<16x1xf32> to vector<16x128xf32>
    %38 = arith.mulf %37, %27 : vector<16x128xf32>
    %cst_24 = arith.constant dense<0.000000e+00> : vector<128xf32>
    %39 = vector.multi_reduction <add>, %38, %cst_24 [0] : vector<16x128xf32> to vector<128xf32>
    %40 = vector.shape_cast %39 : vector<128xf32> to vector<1x128xf32>
    %c0_25 = arith.constant 0 : index
    %c0_26 = arith.constant 0 : index
    %41 = vector.load %arg11[%c0_25, %c0_26] : memref<1x1xf32, #tpu.memory_space<vmem>>, vector<1x1xf32>
    %42 = vector.broadcast %41 : vector<1x1xf32> to vector<1x128xf32>
    %43 = arith.addf %40, %42 : vector<1x128xf32>
    %c0_27 = arith.constant 0 : index
    %c0_28 = arith.constant 0 : index
    %44 = vector.load %arg12[%c0_27, %c0_28] : memref<1x128xf32, #tpu.memory_space<vmem>>, vector<1x128xf32>
    tpu.vector_store %arg12[%c0_27, %c0_28], %35 {strides = array<i32>} : memref<1x128xf32, #tpu.memory_space<vmem>>, vector<1x128xf32>,
    %c0_29 = arith.constant 0 : index
    %c0_30 = arith.constant 0 : index
    %45 = vector.load %arg13[%c0_29, %c0_30] : memref<1x128xf32, #tpu.memory_space<vmem>>, vector<1x128xf32>
    tpu.vector_store %arg13[%c0_29, %c0_30], %43 {strides = array<i32>} : memref<1x128xf32, #tpu.memory_space<vmem>>, vector<1x128xf32>,
    return
  }
  func.func @transform_0(%arg0: i32) -> (i32, i32) {
    %c0_i32 = arith.constant 0 : i32
    %c0_i32_0 = arith.constant 0 : i32
    return %c0_i32, %arg0 : i32, i32
  }
  func.func @transform_1(%arg0: i32) -> (i32, i32) {
    %c0_i32 = arith.constant 0 : i32
    %c0_i32_0 = arith.constant 0 : i32
    %c0_i32_1 = arith.constant 0 : i32
    return %c0_i32, %c0_i32_0 : i32, i32
  }
  func.func @transform_2(%arg0: i32) -> (i32, i32) {
    %c0_i32 = arith.constant 0 : i32
    %c0_i32_0 = arith.constant 0 : i32
    %c0_i32_1 = arith.constant 0 : i32
    return %c0_i32, %c0_i32_0 : i32, i32
  }
  func.func @transform_3(%arg0: i32) -> (i32, i32) {
    %c0_i32 = arith.constant 0 : i32
    %c0_i32_0 = arith.constant 0 : i32
    %c0_i32_1 = arith.constant 0 : i32
    return %c0_i32, %c0_i32_0 : i32, i32
  }
  func.func @transform_4(%arg0: i32) -> (i32, i32) {
    %c0_i32 = arith.constant 0 : i32
    %c0_i32_0 = arith.constant 0 : i32
    %c0_i32_1 = arith.constant 0 : i32
    return %c0_i32, %c0_i32_0 : i32, i32
  }
  func.func @transform_5(%arg0: i32) -> (i32, i32) {
    %c0_i32 = arith.constant 0 : i32
    %c0_i32_0 = arith.constant 0 : i32
    %c0_i32_1 = arith.constant 0 : i32
    return %c0_i32, %c0_i32_0 : i32, i32
  }
  func.func @transform_6(%arg0: i32) -> (i32, i32) {
    %c0_i32 = arith.constant 0 : i32
    %c0_i32_0 = arith.constant 0 : i32
    %c0_i32_1 = arith.constant 0 : i32
    return %c0_i32, %c0_i32_0 : i32, i32
  }
  func.func @transform_7(%arg0: i32) -> (i32, i32) {
    %c0_i32 = arith.constant 0 : i32
    %c0_i32_0 = arith.constant 0 : i32
    %c0_i32_1 = arith.constant 0 : i32
    return %c0_i32, %c0_i32_0 : i32, i32
  }
  func.func @transform_8(%arg0: i32) -> (i32, i32) {
    %c0_i32 = arith.constant 0 : i32
    %c0_i32_0 = arith.constant 0 : i32
    %c0_i32_1 = arith.constant 0 : i32
    return %c0_i32, %c0_i32_0 : i32, i32
  }
  func.func @transform_9(%arg0: i32) -> (i32, i32) {
    %c0_i32 = arith.constant 0 : i32
    %c0_i32_0 = arith.constant 0 : i32
    %c0_i32_1 = arith.constant 0 : i32
    return %c0_i32, %c0_i32_0 : i32, i32
  }
  func.func @transform_10(%arg0: i32) -> (i32, i32) {
    %c0_i32 = arith.constant 0 : i32
    %c0_i32_0 = arith.constant 0 : i32
    %c0_i32_1 = arith.constant 0 : i32
    return %c0_i32, %c0_i32_0 : i32, i32
  }
  func.func @transform_11(%arg0: i32) -> (i32, i32) {
    %c0_i32 = arith.constant 0 : i32
    %c0_i32_0 = arith.constant 0 : i32
    return %c0_i32, %arg0 : i32, i32
  }
  func.func @transform_12(%arg0: i32) -> (i32, i32) {
    %c0_i32 = arith.constant 0 : i32
    %c0_i32_0 = arith.constant 0 : i32
    return %c0_i32, %arg0 : i32, i32
  }
}

</mosaic_0001>

<bundles_post_ra>
// kernel: simple_prob_nn_forward.1
= control target key start
LH: loop header
LB: loop body
LE: loop exit
PB: predicated region body
PF: predicated region fallthrough
CT: control target
= control target key end

     0   :  { %v494_v0 = vmov 0   ;;  %vm214_vm0 = vcmask 523264   ;;  %vm314_vm1 = vcmask 261120   ;;  %s675_s2 = inlined_call_operand.vmem [shape: f32[64,1], index: 2, kind: input, shape index: {}]   ;;  %s676_s1 = inlined_call_operand.vmem [shape: f32[64,1], index: 1, kind: input, shape index: {}]   ;;  %s677_s10 = inlined_call_operand.<no memory space> [shape: f32[1,1], index: 10, kind: input, shape index: {}]   ;;  %s678_s8 = inlined_call_operand.<no memory space> [shape: f32[1,1], index: 8, kind: input, shape index: {}]   ;;  %s679_s4 = inlined_call_operand.vmem [shape: f32[32,1], index: 4, kind: input, shape index: {}]   ;;  %s680_s3 = inlined_call_operand.vmem [shape: bf16[32,64], index: 3, kind: input, shape index: {}]   ;;  %s681_s6 = inlined_call_operand.vmem [shape: f32[32,1], index: 6, kind: input, shape index: {}]   ;;  %s682_s7 = inlined_call_operand.vmem [shape: f32[16,1], index: 7, kind: input, shape index: {}]   ;;  %s683_s9 = inlined_call_operand.vmem [shape: f32[16,1], index: 9, kind: input, shape index: {}]   ;;  %s684_s0 = inlined_call_operand.vmem [shape: f32[1,128], index: 0, kind: input, shape index: {}]   ;;  %s685_s5 = inlined_call_operand.vmem [shape: bf16[32,32], index: 5, kind: input, shape index: {}]   ;;  %s686_s12 = inlined_call_operand.vmem [shape: f32[1,128], index: 12, kind: output, shape index: {1}]   ;;  %s687_s11 = inlined_call_operand.vmem [shape: f32[1,128], index: 11, kind: output, shape index: {0}]  }
   0x1   :  { %489 = vset.pattern.permute.xlu1 %v494_v0  ;;  %488 = vset.pattern.permute.xlu0 %v494_v0  ;;  %v114_v1 = vld [vmem:[%s675_s2 + $0x30] sm:$0xff]  ;;  %v20_v3 = vstv %s677_s10  ;;  %v18_v4 = vstv %s678_s8  ;;  %v115_v5 = vld [vmem:[%s675_s2 + $0x38] sm:$0xff] }
   0x2   :  { %v52_v2 = vld [vmem:[%s676_s1 + $0x30] sm:$0xff]  ;;  %148 = vperm.xlu1 %489, %v114_v1   ;;  %21 = vst [vmem:[#allocation3] sm:$0x1] %v20_v3  ;;  %v53_v6 = vld [vmem:[%s676_s1 + $0x38] sm:$0xff]  ;;  %19 = vst [vmem:[#allocation2] sm:$0x1] %v18_v4 }
   0x3   :  { %86 = vperm.xlu0 %488, %v52_v2   ;;  %v51_v7 = vld [vmem:[%s676_s1 + $0x28] sm:$0xff]  ;;  %v50_v8 = vld [vmem:[%s676_s1 + $0x20] sm:$0xff]  ;;  %v49_v11 = vld [vmem:[%s676_s1 + $0x18] sm:$0xff] }
   0x4   :  { %v113_v9 = vld [vmem:[%s675_s2 + $0x28] sm:$0xff]  ;;  %v112_v10 = vld [vmem:[%s675_s2 + $0x20] sm:$0xff]  ;;  %v48_v12 = vld [vmem:[%s676_s1 + $0x10] sm:$0xff] }
   0x5   :  { %v111_v13 = vld [vmem:[%s675_s2 + $0x18] sm:$0xff]  ;;  %v110_v14 = vld [vmem:[%s675_s2 + $0x10] sm:$0xff]  ;;  %v47_v15 = vld [vmem:[%s676_s1 + $0x8] sm:$0xff] }
   0x6   :  { %153 = vperm.xlu1 %489, %v115_v5   ;;  %v46_v16 = vld [vmem:[%s676_s1] sm:$0xff]  ;;  %v109_v17 = vld [vmem:[%s675_s2 + $0x8] sm:$0xff]  ;;  %v183_v19 = vld [vmem:[%s679_s4 + $0x18] sm:$0xff] }
   0x7   :  { %91 = vperm.xlu0 %488, %v53_v6   ;;  %v108_v18 = vld [vmem:[%s675_s2] sm:$0xff]  ;;  %v182_v20 = vld [vmem:[%s679_s4 + $0x10] sm:$0xff]  ;;  %v181_v22 = vld [vmem:[%s679_s4 + $0x8] sm:$0xff] }
   0x8   :  { %v490_v21 = vld [vmem:[%s680_s3] sm:$0xff]   ;;  %v281_v24 = vld [vmem:[%s681_s6 + $0x8] sm:$0xff]  ;;  %v283_v26 = vld [vmem:[%s681_s6 + $0x18] sm:$0xff] }
   0x9   :  { %v180_v23 = vld [vmem:[%s679_s4] sm:$0xff]  ;;  %475 = vmatprep.mubr.msk.bf16.mxu0 %vm214_vm0, %v490_v21  ;;  %v282_v27 = vld [vmem:[%s681_s6 + $0x10] sm:$0xff]  ;;  %v375_v28 = vld [vmem:[%s682_s7 + $0x8] sm:$0xff] }
   0xa   :  { %81 = vperm.xlu1 %489, %v51_v7   ;;  %v280_v25 = vld [vmem:[%s681_s6] sm:$0xff]  ;;  %v407_v30 = vld [vmem:[%s683_s9 + $0x8] sm:$0xff] }
   0xb   :  { %76 = vperm.xlu0 %488, %v50_v8   ;;  %v374_v29 = vld [vmem:[%s682_s7] sm:$0xff] }
   0xc   :  { %v406_v31 = vld [vmem:[%s683_s9] sm:$0xff] }
   0xd   :  { %v427_v32 = vld [vmem:[#allocation3] sm:$0x1]  ;;  %v395_v33 = vld [vmem:[#allocation2] sm:$0x1] }
   0xe   :  { %143 = vperm.xlu1 %489, %v113_v9   ;;  %v448_v34 = vld [vmem:[%s684_s0] ss:$0 sm:$0xff] }
   0xf   :  { %138 = vperm.xlu0 %488, %v112_v10  }
  0x12   :  { %71 = vperm.xlu1 %489, %v49_v11  }
  0x13   :  { %66 = vperm.xlu0 %488, %v48_v12  }
  0x16   :  { %133 = vperm.xlu1 %489, %v111_v13  }
  0x17   :  { %128 = vperm.xlu0 %488, %v110_v14  }
  0x1a   :  { %61 = vperm.xlu1 %489, %v47_v15   ;;  %v491_v15 = vld [vmem:[%s680_s3 + $0x8] sm:$0xff]  }
  0x1b   :  { %56 = vperm.xlu0 %488, %v46_v16   ;;  %v492_v16 = vld [vmem:[%s685_s5] sm:$0xff]  }
  0x1c   :  { %483 = vmatprep.mubr.msk.bf16.mxu1 %vm314_vm1, %v492_v16 }
  0x1e   :  { %123 = vperm.xlu1 %489, %v109_v17  }
  0x1f   :  { %118 = vperm.xlu0 %488, %v108_v18  }
  0x22   :  { %201 = vperm.xlu1 %489, %v183_v19  }
  0x23   :  { %196 = vperm.xlu0 %488, %v182_v20  }
  0x26   :  { %191 = vperm.xlu1 %489, %v181_v22  }
  0x27   :  { %186 = vperm.xlu0 %488, %v180_v23  }
  0x2a   :  { %291 = vperm.xlu1 %489, %v281_v24  }
  0x2b   :  { %286 = vperm.xlu0 %488, %v280_v25  }
  0x2e   :  { %301 = vperm.xlu1 %489, %v283_v26  }
  0x2f   :  { %296 = vperm.xlu0 %488, %v282_v27  }
  0x32   :  { %383 = vperm.xlu1 %489, %v375_v28  }
  0x33   :  { %378 = vperm.xlu0 %488, %v374_v29  }
  0x36   :  { %415 = vperm.xlu1 %489, %v407_v30  }
  0x37   :  { %410 = vperm.xlu0 %488, %v406_v31  }
  0x3a   :  { %430 = vperm.xlu1 %489, %v427_v32  }
  0x3b   :  { %398 = vperm.xlu0 %488, %v395_v33  }
  0x7d   :  { %v149_v35 = vpop.permute.xlu1 %148 }
  0x7e   :  { %v87_v36 = vpop.permute.xlu0 %86 }
  0x7f   :  { %v106_v37 = vmul.f32 %v448_v34, %v87_v36 }
  0x81   :  { %v154_v38 = vpop.permute.xlu1 %153  ;;  %v162_v40 = vadd.f32 %v149_v35, %v106_v37  ;;  %v493_v35 = vld [vmem:[%s685_s5 + $0x8] sm:$0xff]  }
  0x82   :  { %v92_v39 = vpop.permute.xlu0 %91 }
  0x83   :  { %v107_v41 = vmul.f32 %v448_v34, %v92_v39  ;;  %v170_v45 = vmax.f32 %v162_v40, 0.0 }
  0x85   :  { %v163_v42 = vadd.f32 %v154_v38, %v107_v41  ;;  %v82_v43 = vpop.permute.xlu1 %81 }
  0x86   :  { %v77_v44 = vpop.permute.xlu0 %76  ;;  %v105_v47 = vmul.f32 %v448_v34, %v82_v43 }
  0x87   :  { %v171_v46 = vmax.f32 %v163_v42, 0.0  ;;  %v104_v48 = vmul.f32 %v448_v34, %v77_v44 }
  0x89   :  { %v179_v49 = vpack.c.bf16 %v171_v46, %v170_v45  ;;  %v144_v50 = vpop.permute.xlu1 %143 }
  0x8a   :  { %v139_v51 = vpop.permute.xlu0 %138  ;;  %v161_v52 = vadd.f32 %v144_v50, %v105_v47 }
  0x8b   :  { %v160_v53 = vadd.f32 %v139_v51, %v104_v48  ;;  %467 = vmatprep.subr.bf16.mxu0 %v179_v49 }
  0x8c   :  { %468 = vmatpush3.bf16.msra.mxu0 %v179_v49  ;;  %v169_v54 = vmax.f32 %v161_v52, 0.0 }
  0x8d   :  { %v168_v55 = vmax.f32 %v160_v53, 0.0  ;;  %v72_v56 = vpop.permute.xlu1 %71 }
  0x8e   :  { %v67_v57 = vpop.permute.xlu0 %66  ;;  %v103_v59 = vmul.f32 %v448_v34, %v72_v56 }
  0x8f   :  { %v178_v58 = vpack.c.bf16 %v169_v54, %v168_v55  ;;  %v102_v60 = vmul.f32 %v448_v34, %v67_v57 }
  0x91   :  { %469 = vmatprep.subr.bf16.mxu0 %v178_v58  ;;  %v134_v61 = vpop.permute.xlu1 %133 }
  0x92   :  { %v129_v62 = vpop.permute.xlu0 %128  ;;  %470 = vmatpush3.bf16.msra.mxu0 %v178_v58  ;;  %v159_v63 = vadd.f32 %v134_v61, %v103_v59  ;;  %v401_v58 = vlaneseq }
  0x93   :  { %v158_v0 = vadd.f32 %v129_v62, %v102_v60 }
  0x94   :  { %v167_v1 = vmax.f32 %v159_v63, 0.0 }
  0x95   :  { %v166_v2 = vmax.f32 %v158_v0, 0.0  ;;  %v62_v3 = vpop.permute.xlu1 %61  ;;  %v402_v0 = vshrl.u32 %v401_v58, 7 }
  0x96   :  { %v57_v4 = vpop.permute.xlu0 %56  ;;  %v101_v6 = vmul.f32 %v448_v34, %v62_v3 }
  0x97   :  { %v177_v5 = vpack.c.bf16 %v167_v1, %v166_v2  ;;  %v100_v7 = vmul.f32 %v448_v34, %v57_v4 }
  0x99   :  { %471 = vmatprep.subr.bf16.mxu0 %v177_v5  ;;  %v124_v8 = vpop.permute.xlu1 %123 }
  0x9a   :  { %v119_v9 = vpop.permute.xlu0 %118  ;;  %472 = vmatpush3.bf16.msra.mxu0 %v177_v5  ;;  %v157_v10 = vadd.f32 %v124_v8, %v101_v6  ;;  %v403_v5 = vsub.s32 0, %v402_v0 }
  0x9b   :  { %v156_v11 = vadd.f32 %v119_v9, %v100_v7 }
  0x9c   :  { %v165_v12 = vmax.f32 %v157_v10, 0.0 }
  0x9d   :  { %v164_v13 = vmax.f32 %v156_v11, 0.0  ;;  %v202_v18 = vpop.permute.xlu1 %201 }
  0x9e   :  { %v197_v17 = vpop.permute.xlu0 %196 }
  0x9f   :  { %v176_v14 = vpack.c.bf16 %v165_v12, %v164_v13 }
  0xa1   :  { %473 = vmatprep.subr.bf16.mxu0 %v176_v14  ;;  %v192_v26 = vpop.permute.xlu1 %191 }
  0xa2   :  { %474 = vmatpush3.bf16.msra.mxu0 %v176_v14  ;;  %v187_v22 = vpop.permute.xlu0 %186 }
  0xa5   :  { %476 = vmatmul.mubr.msk.bf16.vlgmr.msra.gmra.mxu0 %vm214_vm0, %v491_v15  ;;  %v292_v36 = vpop.permute.xlu1 %291 }
  0xa6   :  { %v287_v37 = vpop.permute.xlu0 %286 }
  0xa9   :  { %v302_v38 = vpop.permute.xlu1 %301 }
  0xaa   :  { %v297_v39 = vpop.permute.xlu0 %296 }
  0xad   :  { %v384_v41 = vpop.permute.xlu1 %383 }
  0xae   :  { %v379_v43 = vpop.permute.xlu0 %378 }
  0xb1   :  { %v416_v53 = vpop.permute.xlu1 %415 }
  0xb2   :  { %v411_v54 = vpop.permute.xlu0 %410 }
  0xb5   :  { %v431_v8 = vpop.permute.xlu1 %430 }
  0xb6   :  { %v399_v11 = vpop.permute.xlu0 %398  ;;  %v436_v12 = vrot.slane %v431_v8, %v403_v5 }
  0xb7   :  { %v404_v15 = vrot.slane %v399_v11, %v403_v5 }
 0x165   :  { %v477_v19 = vpop.f32.mrf.mxu0 }
 0x166   :  { %v264_v21 = vadd.f32 %v477_v19, %v197_v17 }
 0x167   :  { %v255_v20 = vpop.f32.mrf.mxu0 }
 0x168   :  { %v256_v24 = vadd.f32 %v255_v20, %v187_v22  ;;  %v272_v28 = vmax.f32 %v264_v21, 0.0 }
 0x169   :  { %v478_v23 = vpop.f32.mrf.mxu0 }
 0x16a   :  { %v267_v25 = vadd.f32 %v478_v23, %v202_v18  ;;  %v270_v31 = vmax.f32 %v256_v24, 0.0 }
 0x16b   :  { %v258_v27 = vpop.f32.mrf.mxu0 }
 0x16c   :  { %v273_v29 = vmax.f32 %v267_v25, 0.0  ;;  %v259_v30 = vadd.f32 %v258_v27, %v192_v26 }
 0x16e   :  { %v271_v32 = vmax.f32 %v259_v30, 0.0  ;;  %v279_v33 = vpack.c.bf16 %v273_v29, %v272_v28 }
 0x170   :  { %v278_v34 = vpack.c.bf16 %v271_v32, %v270_v31  ;;  %479 = vmatprep.subr.bf16.mxu1 %v279_v33 }
 0x171   :  { %480 = vmatpush3.bf16.msra.mxu1 %v279_v33 }
 0x172   :  { %481 = vmatprep.subr.bf16.mxu1 %v278_v34 }
 0x175   :  { %482 = vmatpush3.bf16.msra.mxu1 %v278_v34 }
 0x178   :  { %484 = vmatmul.mubr.msk.bf16.vlgmr.msra.gmra.mxu1 %vm314_vm1, %v493_v35 }
 0x238   :  { %v485_v40 = vpop.f32.mrf.mxu1 }
 0x239   :  { %v364_v42 = vadd.f32 %v485_v40, %v297_v39 }
 0x23a   :  { %v355_v44 = vpop.f32.mrf.mxu1 }
 0x23b   :  { %v356_v45 = vadd.f32 %v355_v44, %v287_v37  ;;  %v372_v47 = vmax.f32 %v364_v42, 0.0 }
 0x23c   :  { %v486_v46 = vpop.f32.mrf.mxu1 }
 0x23d   :  { %v367_v48 = vadd.f32 %v486_v46, %v302_v38  ;;  %v370_v50 = vmax.f32 %v356_v45, 0.0  ;;  %v418_v55 = vmul.f32 %v411_v54, %v372_v47 }
 0x23e   :  { %v358_v49 = vpop.f32.mrf.mxu1 }
 0x23f   :  { %v373_v51 = vmax.f32 %v367_v48, 0.0  ;;  %v359_v52 = vadd.f32 %v358_v49, %v292_v36  ;;  %v386_v59 = vmul.f32 %v379_v43, %v370_v50 }
 0x241   :  { %v419_v56 = vmul.f32 %v416_v53, %v373_v51  ;;  %v371_v57 = vmax.f32 %v359_v52, 0.0 }
 0x243   :  { %v420_v60 = vadd.f32 %v419_v56, %v418_v55  ;;  %v387_v61 = vmul.f32 %v384_v41, %v371_v57 }
 0x245   :  { %v421_v62 = vrot.slane %v420_v60, 4  ;;  %v388_v63 = vadd.f32 %v387_v61, %v386_v59 }
 0x247   :  { %v422_v1 = vadd.f32 %v421_v62, %v420_v60  ;;  %v389_v2 = vrot.slane %v388_v63, 4 }
 0x249   :  { %v423_v3 = vrot.slane %v422_v1, 2  ;;  %v390_v4 = vadd.f32 %v389_v2, %v388_v63 }
 0x24b   :  { %v424_v6 = vadd.f32 %v423_v3, %v422_v1  ;;  %v391_v7 = vrot.slane %v390_v4, 2 }
 0x24d   :  { %v425_v9 = vrot.slane %v424_v6, 1  ;;  %v392_v10 = vadd.f32 %v391_v7, %v390_v4 }
 0x24f   :  { %v426_v13 = vadd.f32 %v425_v9, %v424_v6  ;;  %v393_v14 = vrot.slane %v392_v10, 1 }
 0x251   :  { %v437_v16 = vadd.f32 %v436_v12, %v426_v13  ;;  %v394_v17 = vadd.f32 %v393_v14, %v392_v10 }
 0x253   :  { %439 = vst [vmem:[%s686_s12] sm:$0x1] %v437_v16  ;;  %v405_v18 = vadd.f32 %v404_v15, %v394_v17 }
 0x255   :  { %438 = vst [vmem:[%s687_s11] sm:$0x1] %v405_v18 }

</bundles_post_ra>
